<compile_context>
chip_gen: v5e
topology: v5e:2x2
jax: 0.10.0
libtpu: 0.0.40
codegen_flags: <defaults>
</compile_context>

<pallas_src>
import functools

import jax
import jax.numpy as jnp
from jax.experimental import pallas as pl
from jax.experimental.pallas import tpu as pltpu  # noqa: F401  (TPU backend)

_LANE = 128


def _lut3d_fused_kernel(x_ref, w_ref, b_ref, out_ref):
    # One MXU dot over the concatenated [weights | luts] RHS.  Operands enter
    # the MXU in W_cat's storage dtype (bf16 by default); accumulation and the
    # bias add stay fp32; the single output store is lane-dense.
    x = x_ref[...].astype(w_ref.dtype)
    acc = jnp.dot(x, w_ref[...], preferred_element_type=jnp.float32)
    out_ref[...] = (acc + b_ref[...]).astype(out_ref.dtype)


def prepare_params(w1, b1, w2, *, weight_dtype=jnp.bfloat16):
    """One-time (init / weight-update time) parameter preparation.

    w1: (n_ranks, n_feats)  -- weights_generator.weight
    b1: (n_ranks,)          -- weights_generator.bias
    w2: (out_dim, n_ranks)  -- basis_luts_bank.weight, out_dim = n_colors*V**n_colors

    Folds the two Linears (no nonlinearity between them) in fp32, lane-pads the
    first-layer block to 128 columns, concatenates everything into a single
    RHS / bias (so the kernel does one dot + one store), and finally casts the
    weight slab to `weight_dtype`.

    Returns (w_cat, b_cat, meta) with meta = (n_ranks, n_ranks_pad, out_dim).
    """
    n_ranks, n_feats = w1.shape
    out_dim = w2.shape[0]
    n_ranks_pad = ((n_ranks + _LANE - 1) // _LANE) * _LANE
    total = n_ranks_pad + out_dim

    w1t = w1.astype(jnp.float32).T          # (n_feats, n_ranks)
    w2t = w2.astype(jnp.float32).T          # (n_ranks, out_dim)

    # Fold in fp32; cast to the (possibly low-precision) storage dtype LAST.
    w_eff = w1t @ w2t                                           # (n_feats, out_dim)
    b_eff = b1.astype(jnp.float32).reshape(1, n_ranks) @ w2t    # (1, out_dim)

    w_cat = jnp.zeros((n_feats, total), jnp.float32)
    w_cat = w_cat.at[:, :n_ranks].set(w1t)
    w_cat = w_cat.at[:, n_ranks_pad:].set(w_eff)

    b_cat = jnp.zeros((1, total), jnp.float32)
    b_cat = b_cat.at[0, :n_ranks].set(b1.astype(jnp.float32))
    b_cat = b_cat.at[0, n_ranks_pad:].set(b_eff[0])

    return w_cat.astype(weight_dtype), b_cat, (n_ranks, n_ranks_pad, out_dim)


def lut3d_generator_forward(x, params, *, n_colors, n_vertices):
    """x: (B, n_feats) fp32; params: output of prepare_params().

    Returns (weights (B, n_ranks), luts (B, n_colors, V, ..., V)).
    """
    w_cat, b_cat, (n_ranks, n_ranks_pad, out_dim) = params
    B, n_feats = x.shape
    total = n_ranks_pad + out_dim

    flops = 2 * B * n_feats * (n_ranks + out_dim)   # real (unpadded) work
    bytes_accessed = (
        x.size * jnp.dtype(x.dtype).itemsize
        + w_cat.size * jnp.dtype(w_cat.dtype).itemsize
        + b_cat.size * jnp.dtype(b_cat.dtype).itemsize
        + B * total * jnp.dtype(x.dtype).itemsize
    )

    # Grid-less one-shot call: all operands fit comfortably in VMEM on
    # v5e/v6e/v7x, so no grid, no double-buffering, single lane-dense store.
    out = pl.pallas_call(
        _lut3d_fused_kernel,
        out_shape=jax.ShapeDtypeStruct((B, total), x.dtype),
        cost_estimate=pl.CostEstimate(
            flops=flops, transcendentals=0, bytes_accessed=bytes_accessed
        ),
    )(x, w_cat, b_cat)

    weights = out[:, :n_ranks]
    # TODO(synk): downstream trilinear-interp consumers should prefer the flat
    # lane-dense (B, out_dim) slab; the 5-D view below only mirrors the
    # module's return shape (minor dim V=8 < 128 lanes).
    luts = out[:, n_ranks_pad:].reshape((B, -1) + (n_vertices,) * n_colors)
    return weights, luts


def make_params(key, n_colors, n_vertices, n_feats, n_ranks, dtype=jnp.float32):
    """Deterministic parameters (mimics init_weights: identity LUT in rank 0,
    zeros elsewhere; weights_generator bias = ones)."""
    w1 = (jax.random.uniform(key, (n_ranks, n_feats), dtype=dtype) - 0.5) * 0.2
    b1 = jnp.ones((n_ranks,), dtype=dtype)

    coords = jnp.arange(n_vertices, dtype=dtype) / (n_vertices - 1)
    grids = jnp.meshgrid(*([coords] * n_colors), indexing="ij")
    ident = jnp.stack(grids, axis=0)[::-1]                 # (n_colors, V, V, V)
    ident_flat = ident.reshape(-1)                         # (n_colors * V**n_colors,)
    w2 = jnp.zeros((n_colors * n_vertices ** n_colors, n_ranks), dtype=dtype)
    w2 = w2.at[:, 0].set(ident_flat)
    return w1, b1, w2


if __name__ == "__main__":
    n_colors = 3
    n_vertices = 8          # out_dim = 3 * 8**3 = 1536; total cols = 1664 = 13 * 128
    n_feats = 32
    n_ranks = 8
    B = 2

    key = jax.random.PRNGKey(0)
    kx, kp = jax.random.split(key)
    x = jax.random.normal(kx, (B, n_feats), dtype=jnp.float32)
    w1, b1, w2 = make_params(kp, n_colors, n_vertices, n_feats, n_ranks)

    # Reference in plain JAX (unfused fp32, matches the PyTorch module).
    weights_ref = x @ w1.T + b1
    luts_ref = (weights_ref @ w2.T).reshape((B, -1) + (n_vertices,) * n_colors)

    # ---- exact-numerics path (fp32 weight slab) ---------------------------
    params_f32 = prepare_params(w1, b1, w2, weight_dtype=jnp.float32)
    jax.block_until_ready(params_f32)
    fwd_f32 = jax.jit(functools.partial(
        lut3d_generator_forward, params=params_f32,
        n_colors=n_colors, n_vertices=n_vertices))
    weights_f32, luts_f32 = fwd_f32(x)
    jax.block_until_ready((weights_f32, luts_f32))
    assert weights_f32.shape == (B, n_ranks)
    assert luts_f32.shape == (B, n_colors, n_vertices, n_vertices, n_vertices)
    assert jnp.allclose(weights_f32, weights_ref, atol=1e-5, rtol=1e-5)
    assert jnp.allclose(luts_f32, luts_ref, atol=1e-5, rtol=1e-5)

    # ---- default perf path (bf16 weight slab, fp32 accumulate) ------------
    params = prepare_params(w1, b1, w2)              # bf16 storage (default)
    jax.block_until_ready(params)
    fwd = jax.jit(functools.partial(
        lut3d_generator_forward, params=params,
        n_colors=n_colors, n_vertices=n_vertices))
    weights, luts = fwd(x)
    jax.block_until_ready((weights, luts))
    assert weights.shape == (B, n_ranks)
    assert luts.shape == (B, n_colors, n_vertices, n_vertices, n_vertices)
    # bf16 operand storage + folded summation order -> loosened tolerance.
    assert jnp.allclose(weights, weights_ref, atol=3e-2, rtol=3e-2)
    assert jnp.allclose(luts, luts_ref, atol=3e-2, rtol=3e-2)

    print("KERNEL_OK")
</pallas_src>

<mosaic_0001>
module attributes {stable_mosaic.version = 11 : i64} {
  func.func @_lut3d_fused_kernel(%arg0: memref<2x32xf32, #tpu.memory_space<vmem>>, %arg1: memref<32x1664xf32, #tpu.memory_space<vmem>>, %arg2: memref<1x1664xf32, #tpu.memory_space<vmem>>, %arg3: memref<2x1664xf32, #tpu.memory_space<vmem>>) attributes {dimension_semantics = [], scalar_prefetch = 0 : i64, scratch_operands = 0 : i64, tpu.core_type = #tpu.core_type<tc>} {
    %c0 = arith.constant 0 : index
    %c0_0 = arith.constant 0 : index
    %0 = vector.load %arg0[%c0, %c0_0] : memref<2x32xf32, #tpu.memory_space<vmem>>, vector<2x32xf32>
    %c0_1 = arith.constant 0 : index
    %c0_2 = arith.constant 0 : index
    %1 = vector.load %arg1[%c0_1, %c0_2] : memref<32x1664xf32, #tpu.memory_space<vmem>>, vector<32x1664xf32>
    %cst = arith.constant dense<0.000000e+00> : vector<2x1664xf32>
    %2 = tpu.matmul %0, %1, %cst {dimension_numbers = #tpu.dot_dimension_numbers<[1], [0], [0], [1], [0, 0, 1, 1], [], []>} : vector<2x32xf32>, vector<32x1664xf32>, vector<2x1664xf32> -> vector<2x1664xf32>
    %c0_3 = arith.constant 0 : index
    %c0_4 = arith.constant 0 : index
    %3 = vector.load %arg2[%c0_3, %c0_4] : memref<1x1664xf32, #tpu.memory_space<vmem>>, vector<1x1664xf32>
    %4 = vector.broadcast %3 : vector<1x1664xf32> to vector<2x1664xf32>
    %5 = arith.addf %2, %4 : vector<2x1664xf32>
    %c0_5 = arith.constant 0 : index
    %c0_6 = arith.constant 0 : index
    %6 = vector.load %arg3[%c0_5, %c0_6] : memref<2x1664xf32, #tpu.memory_space<vmem>>, vector<2x1664xf32>
    tpu.vector_store %arg3[%c0_5, %c0_6], %5 {strides = array<i32>} : memref<2x1664xf32, #tpu.memory_space<vmem>>, vector<2x1664xf32>,
    return
  }
}

</mosaic_0001>

<bundles_post_ra>
// kernel: lut3d_generator_forward.1
= control target key start
LH: loop header
LB: loop body
LE: loop exit
PB: predicated region body
PF: predicated region fallthrough
CT: control target
= control target key end

     0   :  { %8 = vsyncpa [#allocation3], 0  ;;  %s627_s0 = inlined_call_operand.hbm [shape: f32[2,32], index: 0, kind: input, shape index: {}]   ;;  %s628_s1 = inlined_call_operand.hbm [shape: f32[32,1664], index: 1, kind: input, shape index: {}]   ;;  %s629_s2 = inlined_call_operand.hbm [shape: f32[1,1664], index: 2, kind: input, shape index: {}]   ;;  %s630_s3 = inlined_call_operand.vmem [shape: f32[2,1664], index: 3, kind: output, shape index: {}]  }
   0x1   :  { %9 = vsyncpa [#allocation5], 0  ;;  %s25_s14 = sshll.u32 %s628_s1, 4  ;;  %s544_s15 = smov [#allocation4]   ;;  %s26_s14 = int_to_ptr.hbm [resolvable:$true] %s25_s14 }
   0x2   :  { %s27_s16 = sshll.u32 %s544_s15, 4  ;;  %s15_s19 = sshll.u32 %s627_s0, 4  ;;  %s28_s16 = int_to_ptr.vmem [resolvable:$true] %s27_s16  ;;  %s16_s19 = int_to_ptr.hbm [resolvable:$true] %s15_s19 }
   0x3   :  { %s545_s20 = smov 1664   ;;  %s546_s21 = smov 104  }
   0x4   :  { %33 = dma.hbm_to_vmem [thread:$0]  %s26_s14, 6656, %s28_s16, [#allocation5], %s545_s20, %s545_s20, %s546_s21  }
   0x5   :  { %s547_s22 = smov [#allocation2]   ;;  %s39_s26 = sshll.u32 %s629_s2, 4  ;;  %s40_s26 = int_to_ptr.hbm [resolvable:$true] %s39_s26 }
   0x6   :  { %s17_s23 = sshll.u32 %s547_s22, 4  ;;  %s548_s1 = smov [#allocation6]   ;;  %s18_s23 = int_to_ptr.vmem [resolvable:$true] %s17_s23 }
   0x7   :  { %20 = dma.hbm_to_vmem [thread:$0]  %s16_s19, 32, %s18_s23, [#allocation3]  }
   0x8   :  { %s41_s27 = sshll.u32 %s548_s1, 4  ;;  %s42_s27 = int_to_ptr.vmem [resolvable:$true] %s41_s27 }
   0x9   :  { %44 = dma.hbm_to_vmem [thread:$0]  %s40_s26, 208, %s42_s27, [#allocation5]  }
   0xa   :  { %540 = dma.done.wait [#allocation3], 32  }
   0xb   :  { %541 = vsyncadd [#allocation3], 4294967264 }
   0xc   :  { %542 = dma.done.wait [#allocation5], 6864  }
   0xd   :  { %543 = vsyncadd [#allocation5], 4294960432  ;;  %v98_v0 = vld [vmem:[#allocation4 + $0x140] sm:$0xff]  ;;  %v99_v1 = vld [vmem:[#allocation4 + $0x148] sm:$0xff]  ;;  %vm140_vm0 = vcmask 261120   ;;  %vm425_vm1 = vcmask 1041408  }
   0xe   :  { %v100_v2 = vld [vmem:[#allocation4 + $0x150] sm:$0xff]  ;;  %176 = vmatpush.msra.mxu1 %v98_v0  ;;  %196 = vmatpush.msra.mxu2 %v99_v1  ;;  %v97_v3 = vld [vmem:[#allocation4 + $0x138] sm:$0xff]  ;;  %v86_v5 = vld [vmem:[#allocation4 + $0xe0] sm:$0xff]  ;;  %vm427_vm2 = vcmask 1045508   ;;  %vm429_vm3 = vcmask 1043456  }
   0xf   :  { %v85_v4 = vld [vmem:[#allocation4 + $0xd8] sm:$0xff]  ;;  %216 = vmatpush.msra.mxu3 %v100_v2  ;;  %156 = vmatpush.msra.mxu0 %v97_v3  ;;  %v87_v6 = vld [vmem:[#allocation4 + $0xe8] sm:$0xff]  ;;  %v84_v7 = vld [vmem:[#allocation4 + $0xd0] sm:$0xff] }
  0x10   :  { %v72_v8 = vld [vmem:[#allocation4 + $0x70] sm:$0xff]  ;;  %177 = vmatpush.msra.mxu1 %v85_v4  ;;  %197 = vmatpush.msra.mxu2 %v86_v5  ;;  %v73_v9 = vld [vmem:[#allocation4 + $0x78] sm:$0xff]  ;;  %v74_v10 = vld [vmem:[#allocation4 + $0x80] sm:$0xff] }
  0x11   :  { %v71_v11 = vld [vmem:[#allocation4 + $0x68] sm:$0xff]  ;;  %217 = vmatpush.msra.mxu3 %v87_v6  ;;  %157 = vmatpush.msra.mxu0 %v84_v7  ;;  %v60_v13 = vld [vmem:[#allocation4 + $0x10] sm:$0xff]  ;;  %v61_v14 = vld [vmem:[#allocation4 + $0x18] sm:$0xff] }
  0x12   :  { %v59_v12 = vld [vmem:[#allocation4 + $0x8] sm:$0xff]  ;;  %178 = vmatpush.msra.mxu1 %v72_v8  ;;  %198 = vmatpush.msra.mxu2 %v73_v9  ;;  %v578_v15 = vld [vmem:[#allocation2] sm:$0x3]  ;;  %v104_v17 = vld [vmem:[#allocation4 + $0x170] sm:$0xff] }
  0x13   :  { %218 = vmatpush.msra.mxu3 %v74_v10  ;;  %158 = vmatpush.msra.mxu0 %v71_v11  ;;  %v103_v16 = vld [vmem:[#allocation4 + $0x168] sm:$0xff]  ;;  %v58_v18 = vld [vmem:[#allocation4] sm:$0xff]  ;;  %v101_v21 = vld [vmem:[#allocation4 + $0x158] sm:$0xff] }
  0x14   :  { %179 = vmatpush.msra.mxu1 %v59_v12  ;;  %199 = vmatpush.msra.mxu2 %v60_v13  ;;  %v102_v19 = vld [vmem:[#allocation4 + $0x160] sm:$0xff]  ;;  %v91_v22 = vld [vmem:[#allocation4 + $0x108] sm:$0xff]  ;;  %v89_v23 = vld [vmem:[#allocation4 + $0xf8] sm:$0xff] }
  0x15   :  { %219 = vmatpush.msra.mxu3 %v61_v14  ;;  %451 = vmatmul.msk.f32.vlgmr.msra.gmra.mxu1 %vm140_vm0, %v578_v15  ;;  %v90_v20 = vld [vmem:[#allocation4 + $0x100] sm:$0xff]  ;;  %v77_v24 = vld [vmem:[#allocation4 + $0x98] sm:$0xff]  ;;  %v88_v25 = vld [vmem:[#allocation4 + $0xf0] sm:$0xff] }
  0x16   :  { %452 = vmatmul.msk.f32.vlgmr.msra.gmra.mxu2 %vm140_vm0, %v578_v15  ;;  %453 = vmatmul.msk.f32.vlgmr.msra.gmra.mxu3 %vm140_vm0, %v578_v15  ;;  %v78_v26 = vld [vmem:[#allocation4 + $0xa0] sm:$0xff]  ;;  %v76_v27 = vld [vmem:[#allocation4 + $0x90] sm:$0xff]  ;;  %v75_v29 = vld [vmem:[#allocation4 + $0x88] sm:$0xff] }
  0x17   :  { %276 = vmatpush.msrb.mxu2 %v103_v16  ;;  %296 = vmatpush.msrb.mxu3 %v104_v17  ;;  %v64_v28 = vld [vmem:[#allocation4 + $0x30] sm:$0xff]  ;;  %v65_v30 = vld [vmem:[#allocation4 + $0x38] sm:$0xff]  ;;  %v63_v31 = vld [vmem:[#allocation4 + $0x28] sm:$0xff] }
  0x18   :  { %159 = vmatpush.msra.mxu0 %v58_v18  ;;  %256 = vmatpush.msrb.mxu1 %v102_v19  ;;  %v62_v32 = vld [vmem:[#allocation4 + $0x20] sm:$0xff]  ;;  %v107_v33 = vld [vmem:[#allocation4 + $0x188] sm:$0xff]  ;;  %v108_v34 = vld [vmem:[#allocation4 + $0x190] sm:$0xff] }
  0x19   :  { %450 = vmatmul.msk.f32.vlgmr.msra.gmra.mxu0 %vm140_vm0, %v578_v15  ;;  %277 = vmatpush.msrb.mxu2 %v90_v20  ;;  %v106_v35 = vld [vmem:[#allocation4 + $0x180] sm:$0xff]  ;;  %v105_v37 = vld [vmem:[#allocation4 + $0x178] sm:$0xff]  ;;  %v95_v38 = vld [vmem:[#allocation4 + $0x128] sm:$0xff] }
  0x1a   :  { %236 = vmatpush.msrb.mxu0 %v101_v21  ;;  %297 = vmatpush.msrb.mxu3 %v91_v22  ;;  %v94_v36 = vld [vmem:[#allocation4 + $0x120] sm:$0xff]  ;;  %v93_v39 = vld [vmem:[#allocation4 + $0x118] sm:$0xff]  ;;  %v92_v41 = vld [vmem:[#allocation4 + $0x110] sm:$0xff] }
  0x1b   :  { %257 = vmatpush.msrb.mxu1 %v89_v23  ;;  %278 = vmatpush.msrb.mxu2 %v77_v24  ;;  %v81_v40 = vld [vmem:[#allocation4 + $0xb8] sm:$0xff]  ;;  %v82_v42 = vld [vmem:[#allocation4 + $0xc0] sm:$0xff]  ;;  %v80_v43 = vld [vmem:[#allocation4 + $0xb0] sm:$0xff] }
  0x1c   :  { %237 = vmatpush.msrb.mxu0 %v88_v25  ;;  %298 = vmatpush.msrb.mxu3 %v78_v26  ;;  %v68_v44 = vld [vmem:[#allocation4 + $0x50] sm:$0xff]  ;;  %v79_v45 = vld [vmem:[#allocation4 + $0xa8] sm:$0xff]  ;;  %v69_v46 = vld [vmem:[#allocation4 + $0x58] sm:$0xff] }
  0x1d   :  { %258 = vmatpush.msrb.mxu1 %v76_v27  ;;  %279 = vmatpush.msrb.mxu2 %v64_v28  ;;  %v67_v47 = vld [vmem:[#allocation4 + $0x48] sm:$0xff]  ;;  %v66_v48 = vld [vmem:[#allocation4 + $0x40] sm:$0xff]  ;;  %v109_v49 = vld [vmem:[#allocation4 + $0x198] sm:$0xff] }
  0x1e   :  { %238 = vmatpush.msrb.mxu0 %v75_v29  ;;  %299 = vmatpush.msrb.mxu3 %v65_v30  ;;  %v96_v50 = vld [vmem:[#allocation4 + $0x130] sm:$0xff]  ;;  %v83_v51 = vld [vmem:[#allocation4 + $0xc8] sm:$0xff]  ;;  %v70_v52 = vld [vmem:[#allocation4 + $0x60] sm:$0xff] }
  0x1f   :  { %259 = vmatpush.msrb.mxu1 %v63_v31  ;;  %456 = vmatmul.msk.f32.vlgmr.msrb.gmra.mxu2 %vm140_vm0, %v578_v15  ;;  %v110_v53 = vld [vmem:[#allocation6] sm:$0xff]  ;;  %v111_v18 = vld [vmem:[#allocation6 + $0x8] sm:$0x1f] }
  0x20   :  { %239 = vmatpush.msrb.mxu0 %v62_v32  ;;  %455 = vmatmul.msk.f32.vlgmr.msrb.gmra.mxu1 %vm140_vm0, %v578_v15  ;;  %v115_v54 = vperm.slane %v110_v53, 1  ;;  %v114_v57 = vperm.slane %v110_v53, 0  ;;  %v116_v59 = vperm.slane %v110_v53, 2  ;;  %v117_v60 = vperm.slane %v110_v53, 3 }
  0x21   :  { %457 = vmatmul.msk.f32.vlgmr.msrb.gmra.mxu3 %vm140_vm0, %v578_v15  ;;  %356 = vmatpush.msra.mxu2 %v107_v33  ;;  %v119_v5 = vperm.slane %v110_v53, 5  ;;  %v120_v10 = vperm.slane %v110_v53, 6  ;;  %v118_v13 = vperm.slane %v110_v53, 4  ;;  %v121_v14 = vperm.slane %v110_v53, 7 }
  0x22   :  { %376 = vmatpush.msra.mxu3 %v108_v34  ;;  %336 = vmatpush.msra.mxu1 %v106_v35  ;;  %v123_v24 = vperm.slane %v111_v18, 1  ;;  %v124_v29 = vperm.slane %v111_v18, 2  ;;  %v122_v32 = vperm.slane %v111_v18, 0  ;;  %v125_v33 = vperm.slane %v111_v18, 3 }
  0x23   :  { %454 = vmatmul.msk.f32.vlgmr.msrb.gmra.mxu0 %vm140_vm0, %v578_v15  ;;  %357 = vmatpush.msra.mxu2 %v94_v36  ;;  %v126_v36 = vperm.slane %v111_v18, 4 }
  0x24   :  { %316 = vmatpush.msra.mxu0 %v105_v37  ;;  %377 = vmatpush.msra.mxu3 %v95_v38 }
  0x25   :  { %337 = vmatpush.msra.mxu1 %v93_v39  ;;  %358 = vmatpush.msra.mxu2 %v81_v40 }
  0x26   :  { %317 = vmatpush.msra.mxu0 %v92_v41  ;;  %378 = vmatpush.msra.mxu3 %v82_v42 }
  0x27   :  { %338 = vmatpush.msra.mxu1 %v80_v43  ;;  %359 = vmatpush.msra.mxu2 %v68_v44 }
  0x28   :  { %318 = vmatpush.msra.mxu0 %v79_v45  ;;  %379 = vmatpush.msra.mxu3 %v69_v46 }
  0x29   :  { %339 = vmatpush.msra.mxu1 %v67_v47  ;;  %460 = vmatmul.msk.f32.vlgmr.msra.gmra.mxu2 %vm140_vm0, %v578_v15 }
  0x2a   :  { %319 = vmatpush.msra.mxu0 %v66_v48  ;;  %459 = vmatmul.msk.f32.vlgmr.msra.gmra.mxu1 %vm140_vm0, %v578_v15 }
  0x2b   :  { %461 = vmatmul.msk.f32.vlgmr.msra.gmra.mxu3 %vm140_vm0, %v578_v15  ;;  %458 = vmatmul.msk.f32.vlgmr.msra.gmra.mxu0 %vm140_vm0, %v578_v15 }
  0x2c   :  { %396 = vmatpush.msrb.mxu0 %v109_v49 }
  0x2e   :  { %397 = vmatpush.msrb.mxu0 %v96_v50 }
  0x30   :  { %398 = vmatpush.msrb.mxu0 %v83_v51 }
  0x32   :  { %399 = vmatpush.msrb.mxu0 %v70_v52 }
  0x33   :  { %462 = vmatmul.msk.f32.vlgmr.msrb.gmra.mxu0 %vm140_vm0, %v578_v15 }
  0x92   :  { %v181_v55 = vpop.f32.mrf.mxu1 }
  0x93   :  { %v182_v56 = vadd.f32 %v181_v55, %v115_v54 }
  0x95   :  { %v416_v63 = vrot.slane %v182_v56, 6 }
  0x96   :  { %v161_v58 = vpop.f32.mrf.mxu0 }
  0x97   :  { %v162_v0 = vadd.f32 %v161_v58, %v114_v57 }
  0x99   :  { %v201_v61 = vpop.f32.mrf.mxu2  ;;  %v221_v62 = vpop.f32.mrf.mxu3  ;;  %v426_v6 = vsel %vm425_vm1, %v162_v0, %v416_v63 }
  0x9a   :  { %v202_v1 = vadd.f32 %v201_v61, %v116_v59  ;;  %v222_v2 = vadd.f32 %v221_v62, %v117_v60 }
  0x9c   :  { %v417_v3 = vrot.slane %v202_v1, 4  ;;  %v418_v4 = vrot.slane %v222_v2, 2 }
  0x9d   :  { %v261_v8 = vpop.f32.mrf.mxu1 }
  0x9e   :  { %v428_v7 = vsel %vm427_vm2, %v417_v3, %v418_v4  ;;  %v262_v12 = vadd.f32 %v261_v8, %v119_v5 }
  0x9f   :  { %v430_v9 = vsel %vm429_vm3, %v426_v6, %v428_v7 }
  0xa0   :  { %440 = vst [vmem:[%s630_s3] sm:$0xff] %v430_v9  ;;  %v241_v11 = vpop.f32.mrf.mxu0  ;;  %v419_v19 = vrot.slane %v262_v12, 6 }
  0xa1   :  { %v242_v20 = vadd.f32 %v241_v11, %v118_v13 }
  0xa2   :  { %v281_v15 = vpop.f32.mrf.mxu2 }
  0xa3   :  { %v282_v16 = vadd.f32 %v281_v15, %v120_v10  ;;  %v431_v27 = vsel %vm425_vm1, %v242_v20, %v419_v19 }
  0xa4   :  { %v301_v17 = vpop.f32.mrf.mxu3 }
  0xa5   :  { %v420_v21 = vrot.slane %v282_v16, 4  ;;  %v302_v22 = vadd.f32 %v301_v17, %v121_v14 }
  0xa7   :  { %v421_v23 = vrot.slane %v302_v22, 2  ;;  %v341_v25 = vpop.f32.mrf.mxu1 }
  0xa8   :  { %v321_v26 = vpop.f32.mrf.mxu0  ;;  %v342_v31 = vadd.f32 %v341_v25, %v123_v24 }
  0xa9   :  { %v432_v28 = vsel %vm427_vm2, %v420_v21, %v421_v23  ;;  %v322_v39 = vadd.f32 %v321_v26, %v122_v32 }
  0xaa   :  { %v433_v30 = vsel %vm429_vm3, %v431_v27, %v432_v28  ;;  %v422_v38 = vrot.slane %v342_v31, 6 }
  0xab   :  { %441 = vst [vmem:[%s630_s3 + $0x8] sm:$0xff] %v433_v30 }
  0xac   :  { %v361_v34 = vpop.f32.mrf.mxu2  ;;  %v434_v45 = vsel %vm425_vm1, %v322_v39, %v422_v38 }
  0xad   :  { %v362_v35 = vadd.f32 %v361_v34, %v124_v29 }
  0xae   :  { %v381_v37 = vpop.f32.mrf.mxu3 }
  0xaf   :  { %v423_v40 = vrot.slane %v362_v35, 4  ;;  %v382_v41 = vadd.f32 %v381_v37, %v125_v33 }
  0xb0   :  { %v401_v42 = vpop.f32.mrf.mxu0 }
  0xb1   :  { %v424_v43 = vrot.slane %v382_v41, 2  ;;  %v402_v44 = vadd.f32 %v401_v42, %v126_v36 }
  0xb3   :  { %v435_v46 = vsel %vm427_vm2, %v423_v40, %v424_v43  ;;  %443 = vst [vmem:[%s630_s3 + $0x18] sm:$0x3] %v402_v44 }
  0xb4   :  { %v436_v47 = vsel %vm429_vm3, %v434_v45, %v435_v46 }
  0xb5   :  { %442 = vst [vmem:[%s630_s3 + $0x10] sm:$0xff] %v436_v47 }
  0xb6   :  { %448 = vsyncpa [#allocation3], 1 }
  0xb7   :  { %449 = vsyncpa [#allocation5], 1 }

</bundles_post_ra>
